<compile_context>
chip_gen: v6e
topology: v6e:2x2x1
jax: 0.10.0
libtpu: 0.0.40
codegen_flags: <defaults>
</compile_context>

<pallas_src>
import jax
import jax.numpy as jnp
from jax.experimental import pallas as pl
from jax.experimental.pallas import tpu as pltpu

LANE = 128      # vreg lane width
SUBLANE = 8     # f32 sublane height


def _round_up(n, m):
    return ((n + m - 1) // m) * m


def dqn_kernel(x_ref,
               w0_ref, w1_ref, w2_ref, w3_ref, w4_ref, w5_ref,
               b_ref,
               out_ref):
    """One batch tile of the 6-layer MLP.

    Weights are bf16 and resident across grid steps (constant index_map);
    matmuls accumulate in f32 on the MXU; bias add + ReLU stay in f32.
    """
    h = x_ref[...]  # (TILE_B, S_pad) f32

    def dense(h_f32, w_ref, layer_idx, relu):
        n = w_ref.shape[1]
        y = jnp.dot(h_f32.astype(jnp.bfloat16), w_ref[...],
                    preferred_element_type=jnp.float32)
        y = y + b_ref[layer_idx:layer_idx + 1, :n]
        return jnp.maximum(y, 0.0) if relu else y

    h = dense(h, w0_ref, 0, True)    # input_layer
    h = dense(h, w1_ref, 1, True)    # layer_1
    h = dense(h, w2_ref, 2, True)    # layer_2
    h = dense(h, w3_ref, 3, True)    # layer_3
    h = dense(h, w4_ref, 4, True)    # layer_4
    out = dense(h, w5_ref, 5, False) # layer_5 (no relu)
    out_ref[...] = out.astype(out_ref.dtype)


def dqn_forward(x, params, tile_b=None):
    """x: (B, state_space) f32.  params: list of 6 (W, b), W (in, out) f32, b (out,) f32."""
    B, state_space = x.shape
    out_dims = [w.shape[1] for (w, _) in params]
    action_space = out_dims[-1]

    # ---- pad every lane dim to a multiple of 128 (zero padding keeps ReLU(0)=0 inert) ----
    S_pad = _round_up(state_space, LANE)
    out_pads = [_round_up(d, LANE) for d in out_dims]
    in_dims = [state_space] + out_dims[:-1]
    in_pads = [S_pad] + out_pads[:-1]
    max_w = max(out_pads)

    w_padded = []
    for (w, _), di, dip, do, dop in zip(params, in_dims, in_pads, out_dims, out_pads):
        wp = jnp.zeros((dip, dop), jnp.bfloat16).at[:di, :do].set(w.astype(jnp.bfloat16))
        w_padded.append(wp)

    n_bias_rows = _round_up(len(params), SUBLANE)
    b_stack = jnp.zeros((n_bias_rows, max_w), jnp.float32)
    for i, ((_, b), do) in enumerate(zip(params, out_dims)):
        b_stack = b_stack.at[i, :do].set(b.reshape(-1).astype(jnp.float32))

    # ---- pad + tile the batch ----
    B_pad = _round_up(B, SUBLANE)
    if tile_b is None:
        tile_b = min(256, B_pad)           # 256+ rows keeps the MXU full at real DQN batches
    tile_b = _round_up(min(tile_b, B_pad), SUBLANE)
    B_pad = _round_up(B_pad, tile_b)
    x_pad = jnp.zeros((B_pad, S_pad), jnp.float32).at[:B, :state_space].set(x)

    A_pad = out_pads[-1]
    grid = (B_pad // tile_b,)

    x_spec = pl.BlockSpec((tile_b, S_pad), lambda i: (i, 0))
    w_specs = [pl.BlockSpec(wp.shape, lambda i: (0, 0)) for wp in w_padded]  # resident
    b_spec = pl.BlockSpec(b_stack.shape, lambda i: (0, 0))                   # resident
    out_spec = pl.BlockSpec((tile_b, A_pad), lambda i: (i, 0))

    flops = 2 * B_pad * sum(ip * op for ip, op in zip(in_pads, out_pads))
    bytes_accessed = (x_pad.size * 4 + sum(wp.size * 2 for wp in w_padded)
                      + b_stack.size * 4 + B_pad * A_pad * 4)

    out_pad = pl.pallas_call(
        dqn_kernel,
        out_shape=jax.ShapeDtypeStruct((B_pad, A_pad), jnp.float32),
        grid=grid,
        in_specs=[x_spec] + w_specs + [b_spec],
        out_specs=out_spec,
        compiler_params=pltpu.CompilerParams(
            dimension_semantics=("parallel",)),
        cost_estimate=pl.CostEstimate(flops=flops, transcendentals=0,
                                      bytes_accessed=bytes_accessed),
    )(x_pad, *w_padded, b_stack)

    return out_pad[:B, :action_space]


def init_dqn_params(key, state_space, action_space, layer_size):
    """Kaiming-normal (relu) weights, PyTorch-default uniform biases. W stored (in, out)."""
    dims = [(state_space, layer_size),
            (layer_size, layer_size),
            (layer_size, layer_size),
            (layer_size, layer_size),
            (layer_size, layer_size),
            (layer_size, action_space)]
    params = []
    for fan_in, fan_out in dims:
        key, wk, bk = jax.random.split(key, 3)
        std = (2.0 / fan_in) ** 0.5  # kaiming_normal_, nonlinearity='relu'
        w = std * jax.random.normal(wk, (fan_in, fan_out), dtype=jnp.float32)
        bound = 1.0 / (fan_in ** 0.5)
        b = jax.random.uniform(bk, (fan_out,), jnp.float32, -bound, bound)
        params.append((w, b))
    return params


def reference_forward(x, params):
    """Pure-JAX reference replicating the kernel's numerics (bf16 MXU, f32 accum/epilogue)."""
    h = x
    for li, (w, b) in enumerate(params):
        y = jnp.dot(h.astype(jnp.bfloat16), w.astype(jnp.bfloat16),
                    preferred_element_type=jnp.float32) + b
        h = jnp.maximum(y, 0.0) if li < len(params) - 1 else y
    return h


if __name__ == "__main__":
    key = jax.random.PRNGKey(0)

    batch = 2
    state_space = 16
    action_space = 8
    layer_size = 32

    key, xkey = jax.random.split(key)
    x = jax.random.normal(xkey, (batch, state_space), dtype=jnp.float32)
    params = init_dqn_params(key, state_space, action_space, layer_size)

    out = jax.block_until_ready(dqn_forward(x, params))
    ref = reference_forward(x, params)
    assert out.shape == (batch, action_space)
    assert jnp.allclose(out, ref, atol=1e-3, rtol=1e-3)

    # Exercise the batch grid (multiple tiles) at a still-small shape.
    key, xkey2 = jax.random.split(key)
    x2 = jax.random.normal(xkey2, (20, state_space), dtype=jnp.float32)
    out2 = jax.block_until_ready(dqn_forward(x2, params, tile_b=8))  # grid=(3,)
    ref2 = reference_forward(x2, params)
    assert out2.shape == (20, action_space)
    assert jnp.allclose(out2, ref2, atol=1e-3, rtol=1e-3)

    print("KERNEL_OK")
</pallas_src>

<mosaic_0001>
module attributes {stable_mosaic.version = 11 : i64} {
  func.func @dqn_kernel(%arg0: i32, %arg1: memref<8x128xf32, #tpu.memory_space<vmem>>, %arg2: memref<128x128xbf16, #tpu.memory_space<vmem>>, %arg3: memref<128x128xbf16, #tpu.memory_space<vmem>>, %arg4: memref<128x128xbf16, #tpu.memory_space<vmem>>, %arg5: memref<128x128xbf16, #tpu.memory_space<vmem>>, %arg6: memref<128x128xbf16, #tpu.memory_space<vmem>>, %arg7: memref<128x128xbf16, #tpu.memory_space<vmem>>, %arg8: memref<8x128xf32, #tpu.memory_space<vmem>>, %arg9: memref<8x128xf32, #tpu.memory_space<vmem>>) attributes {dimension_semantics = [#tpu.dimension_semantics<parallel>], iteration_bounds = array<i64: 1>, scalar_prefetch = 0 : i64, scratch_operands = 0 : i64, tpu.core_type = #tpu.core_type<tc>, window_params = [{transform_indices = @transform_0, window_bounds = array<i64: 8, 128>}, {pipeline_mode = #tpu.pipeline_mode<synchronous>, transform_indices = @transform_1, window_bounds = array<i64: 128, 128>}, {pipeline_mode = #tpu.pipeline_mode<synchronous>, transform_indices = @transform_2, window_bounds = array<i64: 128, 128>}, {pipeline_mode = #tpu.pipeline_mode<synchronous>, transform_indices = @transform_3, window_bounds = array<i64: 128, 128>}, {pipeline_mode = #tpu.pipeline_mode<synchronous>, transform_indices = @transform_4, window_bounds = array<i64: 128, 128>}, {pipeline_mode = #tpu.pipeline_mode<synchronous>, transform_indices = @transform_5, window_bounds = array<i64: 128, 128>}, {pipeline_mode = #tpu.pipeline_mode<synchronous>, transform_indices = @transform_6, window_bounds = array<i64: 128, 128>}, {pipeline_mode = #tpu.pipeline_mode<synchronous>, transform_indices = @transform_7, window_bounds = array<i64: 8, 128>}, {transform_indices = @transform_8, window_bounds = array<i64: 8, 128>}]} {
    %c0 = arith.constant 0 : index
    %c0_0 = arith.constant 0 : index
    %0 = vector.load %arg1[%c0, %c0_0] : memref<8x128xf32, #tpu.memory_space<vmem>>, vector<8x128xf32>
    %1 = arith.truncf %0 : vector<8x128xf32> to vector<8x128xbf16>
    %c0_1 = arith.constant 0 : index
    %c0_2 = arith.constant 0 : index
    %2 = vector.load %arg2[%c0_1, %c0_2] : memref<128x128xbf16, #tpu.memory_space<vmem>>, vector<128x128xbf16>
    %cst = arith.constant dense<0.000000e+00> : vector<8x128xf32>
    %3 = tpu.matmul %1, %2, %cst {dimension_numbers = #tpu.dot_dimension_numbers<[1], [0], [0], [1], [0, 0, 1, 1], [], []>} : vector<8x128xbf16>, vector<128x128xbf16>, vector<8x128xf32> -> vector<8x128xf32>
    %c0_3 = arith.constant 0 : index
    %c0_4 = arith.constant 0 : index
    %4 = vector.load %arg8[%c0_3, %c0_4] : memref<8x128xf32, #tpu.memory_space<vmem>>, vector<1x128xf32>
    %5 = vector.broadcast %4 : vector<1x128xf32> to vector<8x128xf32>
    %6 = arith.addf %3, %5 : vector<8x128xf32>
    %cst_5 = arith.constant 0.000000e+00 : f32
    %7 = vector.broadcast %cst_5 : f32 to vector<8x128xf32>
    %8 = arith.maximumf %6, %7 : vector<8x128xf32>
    %9 = arith.truncf %8 : vector<8x128xf32> to vector<8x128xbf16>
    %c0_6 = arith.constant 0 : index
    %c0_7 = arith.constant 0 : index
    %10 = vector.load %arg3[%c0_6, %c0_7] : memref<128x128xbf16, #tpu.memory_space<vmem>>, vector<128x128xbf16>
    %cst_8 = arith.constant dense<0.000000e+00> : vector<8x128xf32>
    %11 = tpu.matmul %9, %10, %cst_8 {dimension_numbers = #tpu.dot_dimension_numbers<[1], [0], [0], [1], [0, 0, 1, 1], [], []>} : vector<8x128xbf16>, vector<128x128xbf16>, vector<8x128xf32> -> vector<8x128xf32>
    %c1 = arith.constant 1 : index
    %c0_9 = arith.constant 0 : index
    %12 = vector.load %arg8[%c1, %c0_9] : memref<8x128xf32, #tpu.memory_space<vmem>>, vector<1x128xf32>
    %13 = vector.broadcast %12 : vector<1x128xf32> to vector<8x128xf32>
    %14 = arith.addf %11, %13 : vector<8x128xf32>
    %cst_10 = arith.constant 0.000000e+00 : f32
    %15 = vector.broadcast %cst_10 : f32 to vector<8x128xf32>
    %16 = arith.maximumf %14, %15 : vector<8x128xf32>
    %17 = arith.truncf %16 : vector<8x128xf32> to vector<8x128xbf16>
    %c0_11 = arith.constant 0 : index
    %c0_12 = arith.constant 0 : index
    %18 = vector.load %arg4[%c0_11, %c0_12] : memref<128x128xbf16, #tpu.memory_space<vmem>>, vector<128x128xbf16>
    %cst_13 = arith.constant dense<0.000000e+00> : vector<8x128xf32>
    %19 = tpu.matmul %17, %18, %cst_13 {dimension_numbers = #tpu.dot_dimension_numbers<[1], [0], [0], [1], [0, 0, 1, 1], [], []>} : vector<8x128xbf16>, vector<128x128xbf16>, vector<8x128xf32> -> vector<8x128xf32>
    %c2 = arith.constant 2 : index
    %c0_14 = arith.constant 0 : index
    %20 = vector.load %arg8[%c2, %c0_14] : memref<8x128xf32, #tpu.memory_space<vmem>>, vector<1x128xf32>
    %21 = vector.broadcast %20 : vector<1x128xf32> to vector<8x128xf32>
    %22 = arith.addf %19, %21 : vector<8x128xf32>
    %cst_15 = arith.constant 0.000000e+00 : f32
    %23 = vector.broadcast %cst_15 : f32 to vector<8x128xf32>
    %24 = arith.maximumf %22, %23 : vector<8x128xf32>
    %25 = arith.truncf %24 : vector<8x128xf32> to vector<8x128xbf16>
    %c0_16 = arith.constant 0 : index
    %c0_17 = arith.constant 0 : index
    %26 = vector.load %arg5[%c0_16, %c0_17] : memref<128x128xbf16, #tpu.memory_space<vmem>>, vector<128x128xbf16>
    %cst_18 = arith.constant dense<0.000000e+00> : vector<8x128xf32>
    %27 = tpu.matmul %25, %26, %cst_18 {dimension_numbers = #tpu.dot_dimension_numbers<[1], [0], [0], [1], [0, 0, 1, 1], [], []>} : vector<8x128xbf16>, vector<128x128xbf16>, vector<8x128xf32> -> vector<8x128xf32>
    %c3 = arith.constant 3 : index
    %c0_19 = arith.constant 0 : index
    %28 = vector.load %arg8[%c3, %c0_19] : memref<8x128xf32, #tpu.memory_space<vmem>>, vector<1x128xf32>
    %29 = vector.broadcast %28 : vector<1x128xf32> to vector<8x128xf32>
    %30 = arith.addf %27, %29 : vector<8x128xf32>
    %cst_20 = arith.constant 0.000000e+00 : f32
    %31 = vector.broadcast %cst_20 : f32 to vector<8x128xf32>
    %32 = arith.maximumf %30, %31 : vector<8x128xf32>
    %33 = arith.truncf %32 : vector<8x128xf32> to vector<8x128xbf16>
    %c0_21 = arith.constant 0 : index
    %c0_22 = arith.constant 0 : index
    %34 = vector.load %arg6[%c0_21, %c0_22] : memref<128x128xbf16, #tpu.memory_space<vmem>>, vector<128x128xbf16>
    %cst_23 = arith.constant dense<0.000000e+00> : vector<8x128xf32>
    %35 = tpu.matmul %33, %34, %cst_23 {dimension_numbers = #tpu.dot_dimension_numbers<[1], [0], [0], [1], [0, 0, 1, 1], [], []>} : vector<8x128xbf16>, vector<128x128xbf16>, vector<8x128xf32> -> vector<8x128xf32>
    %c4 = arith.constant 4 : index
    %c0_24 = arith.constant 0 : index
    %36 = vector.load %arg8[%c4, %c0_24] : memref<8x128xf32, #tpu.memory_space<vmem>>, vector<1x128xf32>
    %37 = vector.broadcast %36 : vector<1x128xf32> to vector<8x128xf32>
    %38 = arith.addf %35, %37 : vector<8x128xf32>
    %cst_25 = arith.constant 0.000000e+00 : f32
    %39 = vector.broadcast %cst_25 : f32 to vector<8x128xf32>
    %40 = arith.maximumf %38, %39 : vector<8x128xf32>
    %41 = arith.truncf %40 : vector<8x128xf32> to vector<8x128xbf16>
    %c0_26 = arith.constant 0 : index
    %c0_27 = arith.constant 0 : index
    %42 = vector.load %arg7[%c0_26, %c0_27] : memref<128x128xbf16, #tpu.memory_space<vmem>>, vector<128x128xbf16>
    %cst_28 = arith.constant dense<0.000000e+00> : vector<8x128xf32>
    %43 = tpu.matmul %41, %42, %cst_28 {dimension_numbers = #tpu.dot_dimension_numbers<[1], [0], [0], [1], [0, 0, 1, 1], [], []>} : vector<8x128xbf16>, vector<128x128xbf16>, vector<8x128xf32> -> vector<8x128xf32>
    %c5 = arith.constant 5 : index
    %c0_29 = arith.constant 0 : index
    %44 = vector.load %arg8[%c5, %c0_29] : memref<8x128xf32, #tpu.memory_space<vmem>>, vector<1x128xf32>
    %45 = vector.broadcast %44 : vector<1x128xf32> to vector<8x128xf32>
    %46 = arith.addf %43, %45 : vector<8x128xf32>
    %c0_30 = arith.constant 0 : index
    %c0_31 = arith.constant 0 : index
    %47 = vector.load %arg9[%c0_30, %c0_31] : memref<8x128xf32, #tpu.memory_space<vmem>>, vector<8x128xf32>
    tpu.vector_store %arg9[%c0_30, %c0_31], %46 {strides = array<i32>} : memref<8x128xf32, #tpu.memory_space<vmem>>, vector<8x128xf32>,
    return
  }
  func.func @transform_0(%arg0: i32) -> (i32, i32) {
    %c0_i32 = arith.constant 0 : i32
    %c0_i32_0 = arith.constant 0 : i32
    return %arg0, %c0_i32 : i32, i32
  }
  func.func @transform_1(%arg0: i32) -> (i32, i32) {
    %c0_i32 = arith.constant 0 : i32
    %c0_i32_0 = arith.constant 0 : i32
    %c0_i32_1 = arith.constant 0 : i32
    return %c0_i32, %c0_i32_0 : i32, i32
  }
  func.func @transform_2(%arg0: i32) -> (i32, i32) {
    %c0_i32 = arith.constant 0 : i32
    %c0_i32_0 = arith.constant 0 : i32
    %c0_i32_1 = arith.constant 0 : i32
    return %c0_i32, %c0_i32_0 : i32, i32
  }
  func.func @transform_3(%arg0: i32) -> (i32, i32) {
    %c0_i32 = arith.constant 0 : i32
    %c0_i32_0 = arith.constant 0 : i32
    %c0_i32_1 = arith.constant 0 : i32
    return %c0_i32, %c0_i32_0 : i32, i32
  }
  func.func @transform_4(%arg0: i32) -> (i32, i32) {
    %c0_i32 = arith.constant 0 : i32
    %c0_i32_0 = arith.constant 0 : i32
    %c0_i32_1 = arith.constant 0 : i32
    return %c0_i32, %c0_i32_0 : i32, i32
  }
  func.func @transform_5(%arg0: i32) -> (i32, i32) {
    %c0_i32 = arith.constant 0 : i32
    %c0_i32_0 = arith.constant 0 : i32
    %c0_i32_1 = arith.constant 0 : i32
    return %c0_i32, %c0_i32_0 : i32, i32
  }
  func.func @transform_6(%arg0: i32) -> (i32, i32) {
    %c0_i32 = arith.constant 0 : i32
    %c0_i32_0 = arith.constant 0 : i32
    %c0_i32_1 = arith.constant 0 : i32
    return %c0_i32, %c0_i32_0 : i32, i32
  }
  func.func @transform_7(%arg0: i32) -> (i32, i32) {
    %c0_i32 = arith.constant 0 : i32
    %c0_i32_0 = arith.constant 0 : i32
    %c0_i32_1 = arith.constant 0 : i32
    return %c0_i32, %c0_i32_0 : i32, i32
  }
  func.func @transform_8(%arg0: i32) -> (i32, i32) {
    %c0_i32 = arith.constant 0 : i32
    %c0_i32_0 = arith.constant 0 : i32
    return %arg0, %c0_i32 : i32, i32
  }
}

</mosaic_0001>

<bundles_post_ra>
// kernel: tpu_custom_call.1
= control target key start
LH: loop header
LB: loop body
LE: loop exit
PB: predicated region body
PF: predicated region fallthrough
CT: control target
= control target key end

     0   :  { %13 = vsyncpa [#allocation3], 0  ;;  %s1444_s0 = inlined_call_operand.hbm [shape: f32[8,128], index: 0, kind: input, shape index: {}]   ;;  %s1445_s1 = inlined_call_operand.hbm [shape: bf16[128,128], index: 1, kind: input, shape index: {}]   ;;  %s1446_s2 = inlined_call_operand.hbm [shape: bf16[128,128], index: 2, kind: input, shape index: {}]   ;;  %s1447_s3 = inlined_call_operand.hbm [shape: bf16[128,128], index: 3, kind: input, shape index: {}]   ;;  %s1448_s4 = inlined_call_operand.hbm [shape: bf16[128,128], index: 4, kind: input, shape index: {}]   ;;  %s1449_s5 = inlined_call_operand.hbm [shape: bf16[128,128], index: 5, kind: input, shape index: {}]   ;;  %s1450_s6 = inlined_call_operand.hbm [shape: bf16[128,128], index: 6, kind: input, shape index: {}]   ;;  %s1451_s7 = inlined_call_operand.vmem [shape: f32[8,128], index: 7, kind: input, shape index: {}]   ;;  %s1452_s8 = inlined_call_operand.hbm [shape: f32[8,128], index: 8, kind: output, shape index: {}]  }
   0x1   :  { %14 = vsyncpa [#allocation6], 0 }
   0x2   :  { %15 = vsyncpa [#allocation9], 0 }
   0x3   :  { %16 = vsyncpa [#allocation12], 0 }
   0x4   :  { %17 = vsyncpa [#allocation4], 0  ;;  %s1267_s27 = smov [#allocation5]  }
   0x5   :  { %s33_s28 = sshll.u32 %s1267_s27, 4  ;;  %s34_s28 = int_to_ptr.vmem [resolvable:$true] %s33_s28 }
   0x6   :  { %s1105_s29 = scalar_lea.vmem %s34_s28, 1024  ;;  %p1110_p1 = scmp.lt.s32.totalorder %s34_s28, %s34_s28 }
   0x7   :  { %p1106_p0 = scmp.ne.s32.totalorder %s34_s28, %s1105_s29  ;;  %p1111_p2 = scmp.lt.s32.totalorder %s1105_s29, %s1105_s29 }
   0x9   :  { %p1112_p3 = por %p1111_p2, %p1110_p1 }
   0xb   :  { %p1113_p4 = pnand %p1112_p3, %p1106_p0 }
   0xd   :  { %1116 = shalt.err (!%p1113_p4)
}
   0xe   :  { %s1268_s30 = smov 64   ;;  %s1269_s9 = smov 4  }
   0xf   :  { %39 = dma.hbm_to_vmem [thread:$0]  %s1445_s1, 1024, %s34_s28, [#allocation6], %s1268_s30, %s1268_s30, %s1269_s9  }
  0x10   :  { %s1270_s12 = smov [#allocation8]   ;;  %s1271_s14 = smov [#allocation11]  }
  0x11   :  { %s57_s13 = sshll.u32 %s1270_s12, 4  ;;  %s81_s15 = sshll.u32 %s1271_s14, 4  ;;  %s58_s13 = int_to_ptr.vmem [resolvable:$true] %s57_s13  ;;  %s82_s15 = int_to_ptr.vmem [resolvable:$true] %s81_s15 }
  0x12   :  { %s1125_s16 = scalar_lea.vmem %s58_s13, 1024  ;;  %p1130_p6 = scmp.lt.s32.totalorder %s58_s13, %s58_s13 }
  0x13   :  { %p1126_p5 = scmp.ne.s32.totalorder %s58_s13, %s1125_s16  ;;  %p1131_p7 = scmp.lt.s32.totalorder %s1125_s16, %s1125_s16 }
  0x15   :  { %p1132_p8 = por %p1131_p7, %p1130_p6 }
  0x17   :  { %p1133_p9 = pnand %p1132_p8, %p1126_p5 }
  0x19   :  { %1136 = shalt.err (!%p1133_p9)
}
  0x1a   :  { %63 = dma.hbm_to_vmem [thread:$0]  %s1447_s3, 1024, %s58_s13, [#allocation9], %s1268_s30, %s1268_s30, %s1269_s9  }
  0x1b   :  { %s1145_s1 = scalar_lea.vmem %s82_s15, 1024  ;;  %p1150_p11 = scmp.lt.s32.totalorder %s82_s15, %s82_s15 }
  0x1c   :  { %p1146_p10 = scmp.ne.s32.totalorder %s82_s15, %s1145_s1  ;;  %p1151_p12 = scmp.lt.s32.totalorder %s1145_s1, %s1145_s1 }
  0x1e   :  { %p1152_p13 = por %p1151_p12, %p1150_p11 }
  0x20   :  { %p1153_p0 = pnand %p1152_p13, %p1146_p10 }
  0x22   :  { %1156 = shalt.err (!%p1153_p0)
}
  0x23   :  { %87 = dma.hbm_to_vmem [thread:$0]  %s1449_s5, 1024, %s82_s15, [#allocation12], %s1268_s30, %s1268_s30, %s1269_s9  }
  0x24   :  { %s1272_s21 = smov [#allocation2]   ;;  %s1273_s23 = smov [#allocation7]  }
  0x25   :  { %s24_s22 = sshll.u32 %s1272_s21, 4  ;;  %s45_s3 = sshll.u32 %s1273_s23, 4  ;;  %s25_s22 = int_to_ptr.vmem [resolvable:$true] %s24_s22  ;;  %s46_s3 = int_to_ptr.vmem [resolvable:$true] %s45_s3 }
  0x26   :  { %s1165_s24 = scalar_lea.vmem %s25_s22, 128  ;;  %p1170_p2 = scmp.lt.s32.totalorder %s25_s22, %s25_s22 }
  0x27   :  { %p1166_p1 = scmp.ne.s32.totalorder %s25_s22, %s1165_s24  ;;  %p1171_p3 = scmp.lt.s32.totalorder %s1165_s24, %s1165_s24 }
  0x29   :  { %p1172_p4 = por %p1171_p3, %p1170_p2 }
  0x2b   :  { %p1173_p5 = pnand %p1172_p4, %p1166_p1 }
  0x2d   :  { %1176 = shalt.err (!%p1173_p5)
}
  0x2e   :  { %27 = dma.hbm_to_vmem [thread:$0]  %s1444_s0, 128, %s25_s22, [#allocation3]  }
  0x2f   :  { %s1185_s27 = scalar_lea.vmem %s46_s3, 1024  ;;  %p1190_p7 = scmp.lt.s32.totalorder %s46_s3, %s46_s3 }
  0x30   :  { %p1186_p6 = scmp.ne.s32.totalorder %s46_s3, %s1185_s27  ;;  %p1191_p8 = scmp.lt.s32.totalorder %s1185_s27, %s1185_s27 }
  0x32   :  { %p1192_p9 = por %p1191_p8, %p1190_p7 }
  0x34   :  { %p1193_p10 = pnand %p1192_p9, %p1186_p6 }
  0x36   :  { %1196 = shalt.err (!%p1193_p10)
}
  0x37   :  { %51 = dma.hbm_to_vmem [thread:$0]  %s1446_s2, 1024, %s46_s3, [#allocation6], %s1268_s30, %s1268_s30, %s1269_s9  }
  0x38   :  { %s1274_s29 = smov [#allocation10]   ;;  %s1275_s11 = smov [#allocation13]  }
  0x39   :  { %s69_s10 = sshll.u32 %s1274_s29, 4  ;;  %s93_s0 = sshll.u32 %s1275_s11, 4  ;;  %s70_s10 = int_to_ptr.vmem [resolvable:$true] %s69_s10  ;;  %s94_s0 = int_to_ptr.vmem [resolvable:$true] %s93_s0 }
  0x3a   :  { %s1205_s12 = scalar_lea.vmem %s70_s10, 1024  ;;  %p1210_p12 = scmp.lt.s32.totalorder %s70_s10, %s70_s10 }
  0x3b   :  { %p1206_p11 = scmp.ne.s32.totalorder %s70_s10, %s1205_s12  ;;  %p1211_p13 = scmp.lt.s32.totalorder %s1205_s12, %s1205_s12 }
  0x3d   :  { %p1212_p0 = por %p1211_p13, %p1210_p12 }
  0x3f   :  { %p1213_p1 = pnand %p1212_p0, %p1206_p11 }
  0x41   :  { %1216 = shalt.err (!%p1213_p1)
}
  0x42   :  { %75 = dma.hbm_to_vmem [thread:$0]  %s1448_s4, 1024, %s70_s10, [#allocation9], %s1268_s30, %s1268_s30, %s1269_s9  }
  0x43   :  { %s1225_s2 = scalar_lea.vmem %s94_s0, 1024  ;;  %p1230_p3 = scmp.lt.s32.totalorder %s94_s0, %s94_s0 }
  0x44   :  { %p1226_p2 = scmp.ne.s32.totalorder %s94_s0, %s1225_s2  ;;  %p1231_p4 = scmp.lt.s32.totalorder %s1225_s2, %s1225_s2 }
  0x46   :  { %p1232_p5 = por %p1231_p4, %p1230_p3 }
  0x48   :  { %p1233_p6 = pnand %p1232_p5, %p1226_p2 }
  0x4a   :  { %1236 = shalt.err (!%p1233_p6)
}
  0x4b   :  { %99 = dma.hbm_to_vmem [thread:$0]  %s1450_s6, 1024, %s94_s0, [#allocation12], %s1268_s30, %s1268_s30, %s1269_s9  }
  0x4c   :  { %1257 = dma.done.wait [#allocation3], 128  }
  0x4d   :  { %1258 = vsyncadd [#allocation3], 4294967168 }
  0x4e   :  { %1259 = dma.done.wait [#allocation6], 2048  }
  0x4f   :  { %1260 = vsyncadd [#allocation6], 4294965248 }
  0x50   :  { %1261 = dma.done.wait [#allocation9], 2048  }
  0x51   :  { %1262 = vsyncadd [#allocation9], 4294965248 }
  0x52   :  { %1263 = dma.done.wait [#allocation12], 2048  }
  0x53   :  { %1264 = vsyncadd [#allocation12], 4294965248  ;;  %v1276_v0 = vmov 0.0   ;;  %vm1277_vm0 = vmmov 0   ;;  %v1049_v1 = vld [vmem:[#allocation5 + $0x38] sm:$0xff]   ;;  %v1050_v2 = vld [vmem:[#allocation5 + $0x30] sm:$0xff]  }
  0x54   :  { %917 = vmatprep.subr.bf16.mxu0 %v1276_v0  ;;  %933 = vmatprep.mubr.msk.bf16.mxu0 %vm1277_vm0, %v1276_v0  ;;  %v1051_v3 = vld [vmem:[#allocation5 + $0x28] sm:$0xff]   ;;  %v1057_v4 = vld [vmem:[#allocation7 + $0x38] sm:$0xff]   ;;  %v1052_v5 = vld [vmem:[#allocation5 + $0x20] sm:$0xff]   ;;  %s1278_s3 = smov [#allocation14]  }
  0x55   :  { %937 = vmatprep.subr.bf16.mxu1 %v1276_v0  ;;  %953 = vmatprep.mubr.msk.bf16.mxu1 %vm1277_vm0, %v1276_v0  ;;  %v1058_v6 = vld [vmem:[#allocation7 + $0x30] sm:$0xff]   ;;  %v1053_v7 = vld [vmem:[#allocation5 + $0x18] sm:$0xff]   ;;  %v1059_v8 = vld [vmem:[#allocation7 + $0x28] sm:$0xff]   ;;  %s797_s24 = sshll.u32 %s1278_s3, 4  ;;  %s798_s24 = int_to_ptr.vmem [resolvable:$true] %s797_s24 }
  0x56   :  { %918 = vmatpush3.bf16.msra.mxu0 %v1049_v1  ;;  %938 = vmatpush3.bf16.msra.mxu1 %v1057_v4  ;;  %v1054_v9 = vld [vmem:[#allocation5 + $0x10] sm:$0xff]   ;;  %v1060_v10 = vld [vmem:[#allocation7 + $0x20] sm:$0xff]   ;;  %v1055_v11 = vld [vmem:[#allocation5 + $0x8] sm:$0xff]   ;;  %s1237_s25 = scalar_lea.vmem %s798_s24, 128  ;;  %p1242_p8 = scmp.lt.s32.totalorder %s798_s24, %s798_s24 }
  0x57   :  { %919 = vmatprep.subr.bf16.mxu0 %v1276_v0  ;;  %939 = vmatprep.subr.bf16.mxu1 %v1276_v0  ;;  %v1061_v12 = vld [vmem:[#allocation7 + $0x18] sm:$0xff]   ;;  %v1056_v13 = vld [vmem:[#allocation5] sm:$0xff]   ;;  %v1062_v15 = vld [vmem:[#allocation7 + $0x10] sm:$0xff]   ;;  %p1238_p7 = scmp.ne.s32.totalorder %s798_s24, %s1237_s25  ;;  %p1243_p9 = scmp.lt.s32.totalorder %s1237_s25, %s1237_s25 }
  0x58   :  { %v124_v14 = vld [vmem:[#allocation2] sm:$0xff]  ;;  %v1063_v17 = vld [vmem:[#allocation7 + $0x8] sm:$0xff]   ;;  %v1064_v18 = vld [vmem:[#allocation7] sm:$0xff]  }
  0x59   :  { %v125_v16 = vpack.c.bf16 %v124_v14, %v124_v14  ;;  %v1065_v19 = vld [vmem:[#allocation8 + $0x38] sm:$0xff]   ;;  %v1066_v20 = vld [vmem:[#allocation8 + $0x30] sm:$0xff]   ;;  %v1067_v21 = vld [vmem:[#allocation8 + $0x28] sm:$0xff]   ;;  %p1244_p10 = por %p1243_p9, %p1242_p8 }
  0x5a   :  { %920 = vmatpush3.bf16.msra.mxu0 %v1050_v2  ;;  %940 = vmatpush3.bf16.msra.mxu1 %v1058_v6  ;;  %v1068_v22 = vld [vmem:[#allocation8 + $0x20] sm:$0xff]   ;;  %v1069_v23 = vld [vmem:[#allocation8 + $0x18] sm:$0xff]   ;;  %v1070_v24 = vld [vmem:[#allocation8 + $0x10] sm:$0xff]  }
  0x5b   :  { %921 = vmatprep.subr.bf16.mxu0 %v1276_v0  ;;  %941 = vmatprep.subr.bf16.mxu1 %v1276_v0  ;;  %v809_v25 = vld [vmem:[%s1451_s7] ss:$0 sm:$0xff]  ;;  %v1071_v33 = vld [vmem:[#allocation8 + $0x8] sm:$0xff]   ;;  %v1072_v34 = vld [vmem:[#allocation8] sm:$0xff]   ;;  %p1245_p11 = pnand %p1244_p10, %p1238_p7 }
  0x5c   :  { %v1073_v35 = vld [vmem:[#allocation10 + $0x38] sm:$0xff]   ;;  %v1074_v36 = vld [vmem:[#allocation10 + $0x30] sm:$0xff]   ;;  %v1075_v37 = vld [vmem:[#allocation10 + $0x28] sm:$0xff]  }
  0x5d   :  { %v1076_v38 = vld [vmem:[#allocation10 + $0x20] sm:$0xff]   ;;  %v1077_v39 = vld [vmem:[#allocation10 + $0x18] sm:$0xff]   ;;  %v1078_v40 = vld [vmem:[#allocation10 + $0x10] sm:$0xff]  }
  0x5e   :  { %922 = vmatpush3.bf16.msra.mxu0 %v1051_v3  ;;  %942 = vmatpush3.bf16.msra.mxu1 %v1059_v8  ;;  %v818_v41 = vld [vmem:[%s1451_s7 + $0x1] ss:$0 sm:$0xff]  ;;  %v1079_v49 = vld [vmem:[#allocation10 + $0x8] sm:$0xff]   ;;  %v1080_v50 = vld [vmem:[#allocation10] sm:$0xff]  }
  0x5f   :  { %923 = vmatprep.subr.bf16.mxu0 %v1276_v0  ;;  %943 = vmatprep.subr.bf16.mxu1 %v1276_v0  ;;  %v1081_v51 = vld [vmem:[#allocation11 + $0x38] sm:$0xff]   ;;  %v1082_v52 = vld [vmem:[#allocation11 + $0x30] sm:$0xff]   ;;  %v1083_v53 = vld [vmem:[#allocation11 + $0x28] sm:$0xff]  }
  0x60   :  { %v1084_v54 = vld [vmem:[#allocation11 + $0x20] sm:$0xff]   ;;  %v1085_v55 = vld [vmem:[#allocation11 + $0x18] sm:$0xff]   ;;  %v1086_v56 = vld [vmem:[#allocation11 + $0x10] sm:$0xff]  }
  0x61   :  { %v827_v57 = vld [vmem:[%s1451_s7 + $0x2] ss:$0 sm:$0xff]  ;;  %v1087_v2 = vld [vmem:[#allocation11 + $0x8] sm:$0xff]   ;;  %v1088_v3 = vld [vmem:[#allocation11] sm:$0xff]  }
  0x62   :  { %924 = vmatpush3.bf16.msra.mxu0 %v1052_v5  ;;  %944 = vmatpush3.bf16.msra.mxu1 %v1060_v10  ;;  %v1089_v4 = vld [vmem:[#allocation13 + $0x38] sm:$0xff]   ;;  %v1090_v5 = vld [vmem:[#allocation13 + $0x30] sm:$0xff]   ;;  %v1091_v6 = vld [vmem:[#allocation13 + $0x28] sm:$0xff]  }
  0x63   :  { %925 = vmatprep.subr.bf16.mxu0 %v1276_v0  ;;  %945 = vmatprep.subr.bf16.mxu1 %v1276_v0  ;;  %v1093_v8 = vld [vmem:[#allocation13 + $0x18] sm:$0xff]  }
  0x64   :  { %v836_v10 = vld [vmem:[%s1451_s7 + $0x3] ss:$0 sm:$0xff] }
  0x66   :  { %926 = vmatpush3.bf16.msra.mxu0 %v1053_v7  ;;  %946 = vmatpush3.bf16.msra.mxu1 %v1061_v12  ;;  %v1092_v7 = vld [vmem:[#allocation13 + $0x20] sm:$0xff]  }
  0x67   :  { %927 = vmatprep.subr.bf16.mxu0 %v1276_v0  ;;  %947 = vmatprep.subr.bf16.mxu1 %v1276_v0 }
  0x6a   :  { %928 = vmatpush3.bf16.msra.mxu0 %v1054_v9  ;;  %948 = vmatpush3.bf16.msra.mxu1 %v1062_v15  ;;  %v1094_v9 = vld [vmem:[#allocation13 + $0x10] sm:$0xff]  }
  0x6b   :  { %929 = vmatprep.subr.bf16.mxu0 %v1276_v0  ;;  %949 = vmatprep.subr.bf16.mxu1 %v1276_v0 }
  0x6e   :  { %930 = vmatpush3.bf16.msra.mxu0 %v1055_v11  ;;  %950 = vmatpush3.bf16.msra.mxu1 %v1063_v17 }
  0x6f   :  { %931 = vmatprep.subr.bf16.mxu0 %v1276_v0  ;;  %951 = vmatprep.subr.bf16.mxu1 %v1276_v0 }
  0x72   :  { %932 = vmatpush3.bf16.msra.mxu0 %v1056_v13  ;;  %952 = vmatpush3.bf16.msra.mxu1 %v1064_v18  ;;  %v1095_v18 = vld [vmem:[#allocation13 + $0x8] sm:$0xff]  }
  0x73   :  { %957 = vmatprep.subr.bf16.mxu0 %v1276_v0  ;;  %977 = vmatprep.subr.bf16.mxu1 %v1276_v0 }
  0x75   :  { %934 = vmatmul.mubr.bf16.vlgmr.msra.gmra.mxu0 %v125_v16 }
  0x76   :  { %973 = vmatprep.mubr.msk.bf16.mxu0 %vm1277_vm0, %v1276_v0  ;;  %958 = vmatpush3.bf16.msra.mxu0 %v1065_v19  ;;  %v1096_v19 = vld [vmem:[#allocation13] sm:$0xff]  }
  0x77   :  { %959 = vmatprep.subr.bf16.mxu0 %v1276_v0 }
  0x7a   :  { %960 = vmatpush3.bf16.msra.mxu0 %v1066_v20  ;;  %v845_v20 = vld [vmem:[%s1451_s7 + $0x4] ss:$0 sm:$0xff] }
  0x7b   :  { %961 = vmatprep.subr.bf16.mxu0 %v1276_v0 }
  0x7e   :  { %962 = vmatpush3.bf16.msra.mxu0 %v1067_v21 }
  0x7f   :  { %963 = vmatprep.subr.bf16.mxu0 %v1276_v0 }
  0x82   :  { %964 = vmatpush3.bf16.msra.mxu0 %v1068_v22 }
  0x83   :  { %965 = vmatprep.subr.bf16.mxu0 %v1276_v0 }
  0x86   :  { %966 = vmatpush3.bf16.msra.mxu0 %v1069_v23 }
  0x87   :  { %967 = vmatprep.subr.bf16.mxu0 %v1276_v0 }
  0x8a   :  { %968 = vmatpush3.bf16.msra.mxu0 %v1070_v24 }
  0x8b   :  { %969 = vmatprep.subr.bf16.mxu0 %v1276_v0 }
  0x8e   :  { %970 = vmatpush3.bf16.msra.mxu0 %v1071_v33 }
  0x8f   :  { %971 = vmatprep.subr.bf16.mxu0 %v1276_v0 }
  0x92   :  { %972 = vmatpush3.bf16.msra.mxu0 %v1072_v34 }
  0x93   :  { %997 = vmatprep.subr.bf16.mxu0 %v1276_v0 }
 0x135   :  { %v229_v26 = vpop.f32.mrf.mxu0 }
 0x136   :  { %v230_v27 = vadd.f32 %v809_v25, %v229_v26 }
 0x137   :  { %v935_v28 = vpop.f32.mrf.mxu0 }
 0x138   :  { %v235_v29 = vmax.f32 %v230_v27, 0.0  ;;  %v854_v28 = vld [vmem:[%s1451_s7 + $0x5] ss:$0 sm:$0xff] }
 0x139   :  { %v232_v30 = vpop.f32.mrf.mxu0 }
 0x13a   :  { %v236_v31 = vpack.c.bf16 %v235_v29, %v235_v29 }
 0x13b   :  { %v936_v32 = vpop.f32.mrf.mxu0 }
 0x13c   :  { %954 = vmatmul.mubr.bf16.vlgmr.msra.gmra.mxu1 %v236_v31 }
 0x13d   :  { %993 = vmatprep.mubr.msk.bf16.mxu1 %vm1277_vm0, %v1276_v0  ;;  %978 = vmatpush3.bf16.msra.mxu1 %v1073_v35 }
 0x13e   :  { %979 = vmatprep.subr.bf16.mxu1 %v1276_v0 }
 0x141   :  { %980 = vmatpush3.bf16.msra.mxu1 %v1074_v36 }
 0x142   :  { %981 = vmatprep.subr.bf16.mxu1 %v1276_v0 }
 0x145   :  { %982 = vmatpush3.bf16.msra.mxu1 %v1075_v37 }
 0x146   :  { %983 = vmatprep.subr.bf16.mxu1 %v1276_v0 }
 0x149   :  { %984 = vmatpush3.bf16.msra.mxu1 %v1076_v38 }
 0x14a   :  { %985 = vmatprep.subr.bf16.mxu1 %v1276_v0 }
 0x14d   :  { %986 = vmatpush3.bf16.msra.mxu1 %v1077_v39 }
 0x14e   :  { %987 = vmatprep.subr.bf16.mxu1 %v1276_v0 }
 0x151   :  { %988 = vmatpush3.bf16.msra.mxu1 %v1078_v40 }
 0x152   :  { %989 = vmatprep.subr.bf16.mxu1 %v1276_v0 }
 0x155   :  { %990 = vmatpush3.bf16.msra.mxu1 %v1079_v49 }
 0x156   :  { %991 = vmatprep.subr.bf16.mxu1 %v1276_v0 }
 0x159   :  { %992 = vmatpush3.bf16.msra.mxu1 %v1080_v50 }
 0x15a   :  { %1017 = vmatprep.subr.bf16.mxu1 %v1276_v0 }
 0x1fc   :  { %v340_v42 = vpop.f32.mrf.mxu1 }
 0x1fd   :  { %v341_v43 = vadd.f32 %v818_v41, %v340_v42 }
 0x1fe   :  { %v955_v44 = vpop.f32.mrf.mxu1 }
 0x1ff   :  { %v346_v45 = vmax.f32 %v341_v43, 0.0 }
 0x200   :  { %v343_v46 = vpop.f32.mrf.mxu1 }
 0x201   :  { %v347_v47 = vpack.c.bf16 %v346_v45, %v346_v45 }
 0x202   :  { %v956_v48 = vpop.f32.mrf.mxu1 }
 0x203   :  { %974 = vmatmul.mubr.bf16.vlgmr.msra.gmra.mxu0 %v347_v47 }
 0x204   :  { %1013 = vmatprep.mubr.msk.bf16.mxu0 %vm1277_vm0, %v1276_v0  ;;  %998 = vmatpush3.bf16.msra.mxu0 %v1081_v51 }
 0x205   :  { %999 = vmatprep.subr.bf16.mxu0 %v1276_v0 }
 0x208   :  { %1000 = vmatpush3.bf16.msra.mxu0 %v1082_v52 }
 0x209   :  { %1001 = vmatprep.subr.bf16.mxu0 %v1276_v0 }
 0x20c   :  { %1002 = vmatpush3.bf16.msra.mxu0 %v1083_v53 }
 0x20d   :  { %1003 = vmatprep.subr.bf16.mxu0 %v1276_v0 }
 0x210   :  { %1004 = vmatpush3.bf16.msra.mxu0 %v1084_v54 }
 0x211   :  { %1005 = vmatprep.subr.bf16.mxu0 %v1276_v0 }
 0x214   :  { %1006 = vmatpush3.bf16.msra.mxu0 %v1085_v55 }
 0x215   :  { %1007 = vmatprep.subr.bf16.mxu0 %v1276_v0 }
 0x218   :  { %1008 = vmatpush3.bf16.msra.mxu0 %v1086_v56 }
 0x219   :  { %1009 = vmatprep.subr.bf16.mxu0 %v1276_v0 }
 0x21c   :  { %1010 = vmatpush3.bf16.msra.mxu0 %v1087_v2 }
 0x21d   :  { %1011 = vmatprep.subr.bf16.mxu0 %v1276_v0 }
 0x220   :  { %1012 = vmatpush3.bf16.msra.mxu0 %v1088_v3 }
 0x2c3   :  { %v451_v58 = vpop.f32.mrf.mxu0 }
 0x2c4   :  { %v452_v59 = vadd.f32 %v827_v57, %v451_v58 }
 0x2c5   :  { %v975_v60 = vpop.f32.mrf.mxu0 }
 0x2c6   :  { %v457_v61 = vmax.f32 %v452_v59, 0.0 }
 0x2c7   :  { %v454_v62 = vpop.f32.mrf.mxu0 }
 0x2c8   :  { %v458_v63 = vpack.c.bf16 %v457_v61, %v457_v61 }
 0x2c9   :  { %v976_v1 = vpop.f32.mrf.mxu0 }
 0x2ca   :  { %994 = vmatmul.mubr.bf16.vlgmr.msra.gmra.mxu1 %v458_v63 }
 0x2cb   :  { %1033 = vmatprep.mubr.msk.bf16.mxu1 %vm1277_vm0, %v1276_v0  ;;  %1018 = vmatpush3.bf16.msra.mxu1 %v1089_v4 }
 0x2cc   :  { %1019 = vmatprep.subr.bf16.mxu1 %v1276_v0 }
 0x2cf   :  { %1020 = vmatpush3.bf16.msra.mxu1 %v1090_v5 }
 0x2d0   :  { %1021 = vmatprep.subr.bf16.mxu1 %v1276_v0 }
 0x2d3   :  { %1022 = vmatpush3.bf16.msra.mxu1 %v1091_v6 }
 0x2d4   :  { %1023 = vmatprep.subr.bf16.mxu1 %v1276_v0 }
 0x2d7   :  { %1024 = vmatpush3.bf16.msra.mxu1 %v1092_v7 }
 0x2d8   :  { %1025 = vmatprep.subr.bf16.mxu1 %v1276_v0 }
 0x2db   :  { %1026 = vmatpush3.bf16.msra.mxu1 %v1093_v8 }
 0x2dc   :  { %1027 = vmatprep.subr.bf16.mxu1 %v1276_v0 }
 0x2df   :  { %1028 = vmatpush3.bf16.msra.mxu1 %v1094_v9 }
 0x2e0   :  { %1029 = vmatprep.subr.bf16.mxu1 %v1276_v0 }
 0x2e3   :  { %1030 = vmatpush3.bf16.msra.mxu1 %v1095_v18 }
 0x2e4   :  { %1031 = vmatprep.subr.bf16.mxu1 %v1276_v0 }
 0x2e7   :  { %1032 = vmatpush3.bf16.msra.mxu1 %v1096_v19 }
 0x38a   :  { %v562_v11 = vpop.f32.mrf.mxu1 }
 0x38b   :  { %v563_v12 = vadd.f32 %v836_v10, %v562_v11 }
 0x38c   :  { %v995_v13 = vpop.f32.mrf.mxu1 }
 0x38d   :  { %v568_v14 = vmax.f32 %v563_v12, 0.0 }
 0x38e   :  { %v565_v15 = vpop.f32.mrf.mxu1 }
 0x38f   :  { %v569_v16 = vpack.c.bf16 %v568_v14, %v568_v14 }
 0x390   :  { %v996_v17 = vpop.f32.mrf.mxu1 }
 0x391   :  { %1014 = vmatmul.mubr.bf16.vlgmr.msra.gmra.mxu0 %v569_v16 }
 0x451   :  { %v673_v21 = vpop.f32.mrf.mxu0 }
 0x452   :  { %v674_v22 = vadd.f32 %v845_v20, %v673_v21 }
 0x453   :  { %v1015_v23 = vpop.f32.mrf.mxu0 }
 0x454   :  { %v679_v24 = vmax.f32 %v674_v22, 0.0 }
 0x455   :  { %v676_v25 = vpop.f32.mrf.mxu0 }
 0x456   :  { %v680_v26 = vpack.c.bf16 %v679_v24, %v679_v24 }
 0x457   :  { %v1016_v27 = vpop.f32.mrf.mxu0 }
 0x458   :  { %1034 = vmatmul.mubr.bf16.vlgmr.msra.gmra.mxu1 %v680_v26 }
 0x518   :  { %v784_v0 = vpop.f32.mrf.mxu1 }
 0x519   :  { %v785_v29 = vadd.f32 %v854_v28, %v784_v0 }
 0x51a   :  { %v1035_v30 = vpop.f32.mrf.mxu1 }
 0x51b   :  { %790 = vst [vmem:[#allocation14] sm:$0xff] %v785_v29 }
 0x51c   :  { %v787_v31 = vpop.f32.mrf.mxu1 }
 0x51d   :  { %1248 = shalt.err (!%p1245_p11)
}
 0x51e   :  { %800 = dma.vmem_to_hbm [thread:$0]  %s798_s24, 128, %s1452_s8, [#allocation4]   ;;  %v1036_v32 = vpop.f32.mrf.mxu1 }
 0x51f   :  { %1265 = dma.done.wait [#allocation4], 128  }
 0x520   :  { %1266 = vsyncadd [#allocation4], 4294967168 }
 0x521   :  { %804 = vsyncpa [#allocation3], 1 }
 0x522   :  { %805 = vsyncpa [#allocation6], 1 }
 0x523   :  { %806 = vsyncpa [#allocation9], 1 }
 0x524   :  { %807 = vsyncpa [#allocation12], 1 }
 0x525   :  { %808 = vsyncpa [#allocation4], 1 }

</bundles_post_ra>
